<compile_context>
chip_gen: v6e
topology: v6e:2x2x1
jax: 0.10.0
libtpu: 0.0.40
codegen_flags: <defaults>
</compile_context>

<pallas_src>
import functools
import math

import jax
import jax.numpy as jnp
from jax.experimental import pallas as pl
from jax.experimental.pallas import tpu as pltpu

BN_EPS = 1e-5
LN_EPS = math.log(1e-6)   # for the overflow-safe log(1e-6 + exp(z))


def pfe_head_kernel(x_ref, w1_ref, chan_ref, w2_ref, gb_ref, o_ref,
                    acc_ref, ssq_ref):
    k = pl.program_id(0)

    @pl.when(k == 0)
    def _init():
        acc_ref[...] = jnp.zeros_like(acc_ref)
        ssq_ref[...] = jnp.zeros_like(ssq_ref)

    x = x_ref[...]                                            # (B, TK) f32
    # ||x||^2 accumulated per tile (L2 norm commuted through fc1).
    ssq_ref[...] += jnp.sum(x * x, axis=-1, keepdims=True)
    # fc1 partial product on the MXU, bf16 inputs, f32 accumulation.
    acc_ref[...] += jnp.dot(x.astype(jnp.bfloat16), w1_ref[...],
                            preferred_element_type=jnp.float32)

    @pl.when(k == pl.num_programs(0) - 1)
    def _finalize():
        # Per-channel params packed into one resident (4, C) slab:
        # rows = [fc1 bias, bn1 gamma, bn1 beta, fc2 bias].
        chan = chan_ref[...]
        b1, g1, be1, b2 = chan[0:1], chan[1:2], chan[2:3], chan[3:4]

        # Apply the commuted L2 normalization, then the fc1 bias.
        # NOTE: like the PyTorch module, an all-zero input row yields inf/nan.
        h = acc_ref[...] * jax.lax.rsqrt(ssq_ref[...]) + b1

        # bn1: train-mode batch statistics (biased variance), affine.
        # Single-pass E[h^2] - mu^2 form (shorter serial reduce chain).
        mu1 = jnp.mean(h, axis=0, keepdims=True)
        var1 = jnp.maximum(jnp.mean(h * h, axis=0, keepdims=True) - mu1 * mu1,
                           0.0)
        h = (h - mu1) * jax.lax.rsqrt(var1 + BN_EPS)
        h = h * g1 + be1

        # ReLU
        h = jnp.maximum(h, 0.0)

        # fc2: (B, C) @ (C, C) + b2 in f32 (epilogue precision is free).
        z = jnp.dot(h, w2_ref[...].astype(jnp.float32),
                    preferred_element_type=jnp.float32) + b2

        # bn2: train-mode batch statistics, no affine.
        mu2 = jnp.mean(z, axis=0, keepdims=True)
        var2 = jnp.maximum(jnp.mean(z * z, axis=0, keepdims=True) - mu2 * mu2,
                           0.0)
        z = (z - mu2) * jax.lax.rsqrt(var2 + BN_EPS)

        # gamma * z + beta  (scalars read from SMEM)
        z = gb_ref[0] * z + gb_ref[1]

        # log(1e-6 + exp(z)), overflow-safe rewrite (identical for finite z).
        m = jnp.maximum(z, LN_EPS)
        o_ref[...] = m + jnp.log(jnp.exp(LN_EPS - m) + jnp.exp(z - m))


def _round_up(x, m):
    return (x + m - 1) // m * m


def _pick_tk(d_pad, target):
    """Largest multiple of 128 that divides d_pad and is <= target."""
    best = 128
    m = 128
    while m <= min(target, d_pad):
        if d_pad % m == 0:
            best = m
        m += 128
    return best


def prepare_params(w1, b1, g1, be1, w2, b2, gamma_beta):
    """One-time host-side prep (outside jit):
    pad w1 to a lane-aligned K (zero rows do not change the result) and pack
    the small per-channel params into a single (4, C) f32 slab so the kernel
    pays one resident DMA instead of four."""
    d_in, _ = w1.shape
    d_pad = _round_up(d_in, 128)
    if d_pad != d_in:
        w1 = jnp.pad(w1, ((0, d_pad - d_in), (0, 0)))
    chan = jnp.concatenate(
        [b1.astype(jnp.float32), g1.astype(jnp.float32),
         be1.astype(jnp.float32), b2.astype(jnp.float32)], axis=0)   # (4, C)
    return w1, chan, w2, gamma_beta


@functools.partial(jax.jit, static_argnames=("tk_target",))
def pfe_head_forward(x, w1, chan, w2, gamma_beta, *, tk_target=7168):
    """w1 must already be K-padded (see prepare_params)."""
    B, d_in = x.shape
    d_pad, C = w1.shape

    if d_pad != d_in:
        # Only the (small) activation is padded in-jit; w1 was padded offline.
        x = jnp.pad(x, ((0, 0), (0, d_pad - d_in)))

    tk = _pick_tk(d_pad, tk_target)
    nk = d_pad // tk

    grid_spec = pltpu.PrefetchScalarGridSpec(
        num_scalar_prefetch=0,
        grid=(nk,),
        in_specs=[
            pl.BlockSpec((B, tk), lambda k: (0, k)),            # x: K tiles
            pl.BlockSpec((tk, C), lambda k: (k, 0)),            # w1: K tiles
            pl.BlockSpec((4, C), lambda k: (0, 0)),             # packed channel params
            pl.BlockSpec((C, C), lambda k: (0, 0)),             # w2 (resident)
            pl.BlockSpec(memory_space=pltpu.MemorySpace.SMEM),  # gamma/beta scalars
        ],
        out_specs=pl.BlockSpec((B, C), lambda k: (0, 0)),
        scratch_shapes=[
            pltpu.VMEM((B, C), jnp.float32),   # fc1 accumulator
            pltpu.VMEM((B, 1), jnp.float32),   # sum(x^2) accumulator
        ],
    )

    bytes_accessed = (x.size * x.dtype.itemsize
                      + w1.size * w1.dtype.itemsize
                      + w2.size * w2.dtype.itemsize
                      + chan.size * 4
                      + gamma_beta.size * 4
                      + B * C * 4)
    cost = pl.CostEstimate(
        flops=2 * B * d_pad * C + 2 * B * C * C,
        transcendentals=6 * B * C + B,
        bytes_accessed=int(bytes_accessed),
    )

    return pl.pallas_call(
        pfe_head_kernel,
        out_shape=jax.ShapeDtypeStruct((B, C), jnp.float32),
        grid_spec=grid_spec,
        compiler_params=pltpu.CompilerParams(
            dimension_semantics=("arbitrary",),   # K is a reduction axis
            vmem_limit_bytes=32 * 1024 * 1024,    # safe on v5e/v6e/v7x
        ),
        cost_estimate=cost,
    )(x, w1, chan, w2, gamma_beta)


def init_params(key, in_feat):
    d_in = in_feat * 6 * 7
    k1, k2, k3, k4 = jax.random.split(key, 4)
    # Deterministic synthetic init (roughly PyTorch's uniform fan-in scaling).
    lim1 = 1.0 / math.sqrt(d_in)
    w1 = jax.random.uniform(k1, (d_in, in_feat), jnp.float32, -lim1, lim1)
    b1 = jax.random.uniform(k2, (1, in_feat), jnp.float32, -lim1, lim1)
    lim2 = 1.0 / math.sqrt(in_feat)
    w2 = jax.random.uniform(k3, (in_feat, in_feat), jnp.float32, -lim2, lim2)
    b2 = jax.random.uniform(k4, (1, in_feat), jnp.float32, -lim2, lim2)
    # Weights stored bf16 (streamed through the MXU); small params stay f32.
    w1 = w1.astype(jnp.bfloat16)
    w2 = w2.astype(jnp.bfloat16)
    # bn1 affine params (PyTorch init: weight=1, bias=0)
    g1 = jnp.ones((1, in_feat), jnp.float32)
    be1 = jnp.zeros((1, in_feat), jnp.float32)
    # learnable scalar gamma / beta from the module's __init__
    gamma_beta = jnp.array([0.0001, -7.0], jnp.float32)
    return w1, b1, g1, be1, w2, b2, gamma_beta


def reference_forward(x, w1, b1, g1, be1, w2, b2, gamma_beta):
    w1 = w1.astype(jnp.float32)
    w2 = w2.astype(jnp.float32)
    x = x / jnp.linalg.norm(x, axis=-1, keepdims=True)
    h = x @ w1 + b1
    mu, var = jnp.mean(h, 0, keepdims=True), jnp.var(h, 0, keepdims=True)
    h = (h - mu) / jnp.sqrt(var + BN_EPS) * g1 + be1
    h = jnp.maximum(h, 0.0)
    z = h @ w2 + b2
    mu, var = jnp.mean(z, 0, keepdims=True), jnp.var(z, 0, keepdims=True)
    z = (z - mu) / jnp.sqrt(var + BN_EPS)
    z = gamma_beta[0] * z + gamma_beta[1]
    return jnp.log(1e-6 + jnp.exp(z))


if __name__ == "__main__":
    in_feat = 32            # small stand-in for the production 512
    batch = 8
    d_in = in_feat * 6 * 7  # 1344

    key = jax.random.PRNGKey(0)
    kx, kp = jax.random.split(key)
    x = jax.random.normal(kx, (batch, d_in), jnp.float32)
    raw_params = init_params(kp, in_feat)

    # One-time host-side prep: pad w1 (1344 -> 1408) and pack channel params.
    prepared = prepare_params(*raw_params)

    # Small tile target so even the toy size exercises the K-tiled streaming
    # pipeline (padded 1408 -> 11 grid steps of TK=128).  Production uses the
    # default tk_target=7168 (d_pad=21504 -> 3 grid steps).
    out = pfe_head_forward(x, *prepared, tk_target=256)
    out = jax.block_until_ready(out)

    ref = reference_forward(x, *raw_params)
    assert out.shape == (batch, in_feat)
    assert bool(jnp.all(jnp.isfinite(out)))
    assert jnp.allclose(out, ref, atol=1e-4, rtol=1e-4), "mismatch vs JAX reference"

    print("KERNEL_OK")
</pallas_src>

<mosaic_0001>
module attributes {stable_mosaic.version = 11 : i64} {
  func.func @pfe_head_kernel(%arg0: i32, %arg1: memref<8x128xf32, #tpu.memory_space<vmem>>, %arg2: memref<128x32xbf16, #tpu.memory_space<vmem>>, %arg3: memref<4x32xf32, #tpu.memory_space<vmem>>, %arg4: memref<32x32xbf16, #tpu.memory_space<vmem>>, %arg5: memref<2xf32, #tpu.memory_space<smem>>, %arg6: memref<8x32xf32, #tpu.memory_space<vmem>>, %arg7: memref<8x32xf32, #tpu.memory_space<vmem>>, %arg8: memref<8x1xf32, #tpu.memory_space<vmem>>) attributes {dimension_semantics = [#tpu.dimension_semantics<arbitrary>], iteration_bounds = array<i64: 11>, scalar_prefetch = 0 : i64, scratch_operands = 2 : i64, tpu.core_type = #tpu.core_type<tc>, window_params = [{transform_indices = @transform_0, window_bounds = array<i64: 8, 128>}, {transform_indices = @transform_1, window_bounds = array<i64: 128, 32>}, {pipeline_mode = #tpu.pipeline_mode<synchronous>, transform_indices = @transform_2, window_bounds = array<i64: 4, 32>}, {pipeline_mode = #tpu.pipeline_mode<synchronous>, transform_indices = @transform_3, window_bounds = array<i64: 32, 32>}, {transform_indices = @transform_4, window_bounds = array<i64: 2>}, {pipeline_mode = #tpu.pipeline_mode<synchronous>, transform_indices = @transform_5, window_bounds = array<i64: 8, 32>}]} {
    %c0_i32 = arith.constant 0 : i32
    %0 = arith.cmpi eq, %arg0, %c0_i32 : i32
    %1 = arith.extui %0 : i1 to i32
    %c0_i32_0 = arith.constant 0 : i32
    %2 = arith.cmpi ne, %1, %c0_i32_0 : i32
    scf.if %2 {
      %cst_14 = arith.constant 0.000000e+00 : f32
      %19 = vector.broadcast %cst_14 : f32 to vector<8x32xf32>
      %c0_15 = arith.constant 0 : index
      %c0_16 = arith.constant 0 : index
      %20 = vector.load %arg7[%c0_15, %c0_16] : memref<8x32xf32, #tpu.memory_space<vmem>>, vector<8x32xf32>
      tpu.vector_store %arg7[%c0_15, %c0_16], %19 {strides = array<i32>} : memref<8x32xf32, #tpu.memory_space<vmem>>, vector<8x32xf32>,
      %cst_17 = arith.constant 0.000000e+00 : f32
      %21 = vector.broadcast %cst_17 : f32 to vector<8x1xf32>
      %c0_18 = arith.constant 0 : index
      %c0_19 = arith.constant 0 : index
      %22 = vector.load %arg8[%c0_18, %c0_19] : memref<8x1xf32, #tpu.memory_space<vmem>>, vector<8x1xf32>
      tpu.vector_store %arg8[%c0_18, %c0_19], %21 {strides = array<i32>} : memref<8x1xf32, #tpu.memory_space<vmem>>, vector<8x1xf32>,
    } else {
    }
    %c0 = arith.constant 0 : index
    %c0_1 = arith.constant 0 : index
    %3 = vector.load %arg1[%c0, %c0_1] : memref<8x128xf32, #tpu.memory_space<vmem>>, vector<8x128xf32>
    %c0_2 = arith.constant 0 : index
    %c0_3 = arith.constant 0 : index
    %4 = vector.load %arg8[%c0_2, %c0_3] : memref<8x1xf32, #tpu.memory_space<vmem>>, vector<8x1xf32>
    %5 = arith.mulf %3, %3 : vector<8x128xf32>
    %cst = arith.constant dense<0.000000e+00> : vector<8xf32>
    %6 = vector.multi_reduction <add>, %5, %cst [1] : vector<8x128xf32> to vector<8xf32>
    %7 = vector.shape_cast %6 : vector<8xf32> to vector<8x1xf32>
    %8 = arith.addf %4, %7 : vector<8x1xf32>
    %c0_4 = arith.constant 0 : index
    %c0_5 = arith.constant 0 : index
    %9 = vector.load %arg8[%c0_4, %c0_5] : memref<8x1xf32, #tpu.memory_space<vmem>>, vector<8x1xf32>
    tpu.vector_store %arg8[%c0_4, %c0_5], %8 {strides = array<i32>} : memref<8x1xf32, #tpu.memory_space<vmem>>, vector<8x1xf32>,
    %c0_6 = arith.constant 0 : index
    %c0_7 = arith.constant 0 : index
    %10 = vector.load %arg7[%c0_6, %c0_7] : memref<8x32xf32, #tpu.memory_space<vmem>>, vector<8x32xf32>
    %11 = arith.truncf %3 : vector<8x128xf32> to vector<8x128xbf16>
    %c0_8 = arith.constant 0 : index
    %c0_9 = arith.constant 0 : index
    %12 = vector.load %arg2[%c0_8, %c0_9] : memref<128x32xbf16, #tpu.memory_space<vmem>>, vector<128x32xbf16>
    %cst_10 = arith.constant dense<0.000000e+00> : vector<8x32xf32>
    %13 = tpu.matmul %11, %12, %cst_10 {dimension_numbers = #tpu.dot_dimension_numbers<[1], [0], [0], [1], [0, 0, 1, 1], [], []>} : vector<8x128xbf16>, vector<128x32xbf16>, vector<8x32xf32> -> vector<8x32xf32>
    %14 = arith.addf %10, %13 : vector<8x32xf32>
    %c0_11 = arith.constant 0 : index
    %c0_12 = arith.constant 0 : index
    %15 = vector.load %arg7[%c0_11, %c0_12] : memref<8x32xf32, #tpu.memory_space<vmem>>, vector<8x32xf32>
    tpu.vector_store %arg7[%c0_11, %c0_12], %14 {strides = array<i32>} : memref<8x32xf32, #tpu.memory_space<vmem>>, vector<8x32xf32>,
    %c10_i32 = arith.constant 10 : i32
    %16 = arith.cmpi eq, %arg0, %c10_i32 : i32
    %17 = arith.extui %16 : i1 to i32
    %c0_i32_13 = arith.constant 0 : i32
    %18 = arith.cmpi ne, %17, %c0_i32_13 : i32
    scf.if %18 {
      %c0_14 = arith.constant 0 : index
      %c0_15 = arith.constant 0 : index
      %19 = vector.load %arg3[%c0_14, %c0_15] : memref<4x32xf32, #tpu.memory_space<vmem>>, vector<4x32xf32>
      %20 = vector.extract_strided_slice %19 {offsets = [0, 0], sizes = [1, 32], strides = [1, 1]} : vector<4x32xf32> to vector<1x32xf32>
      %21 = vector.extract_strided_slice %19 {offsets = [1, 0], sizes = [1, 32], strides = [1, 1]} : vector<4x32xf32> to vector<1x32xf32>
      %22 = vector.extract_strided_slice %19 {offsets = [2, 0], sizes = [1, 32], strides = [1, 1]} : vector<4x32xf32> to vector<1x32xf32>
      %23 = vector.extract_strided_slice %19 {offsets = [3, 0], sizes = [1, 32], strides = [1, 1]} : vector<4x32xf32> to vector<1x32xf32>
      %c0_16 = arith.constant 0 : index
      %c0_17 = arith.constant 0 : index
      %24 = vector.load %arg7[%c0_16, %c0_17] : memref<8x32xf32, #tpu.memory_space<vmem>>, vector<8x32xf32>
      %c0_18 = arith.constant 0 : index
      %c0_19 = arith.constant 0 : index
      %25 = vector.load %arg8[%c0_18, %c0_19] : memref<8x1xf32, #tpu.memory_space<vmem>>, vector<8x1xf32>
      %26 = math.rsqrt %25 : vector<8x1xf32>
      %27 = vector.broadcast %26 : vector<8x1xf32> to vector<8x32xf32>
      %28 = arith.mulf %24, %27 : vector<8x32xf32>
      %29 = vector.broadcast %20 : vector<1x32xf32> to vector<8x32xf32>
      %30 = arith.addf %28, %29 : vector<8x32xf32>
      %cst_20 = arith.constant dense<0.000000e+00> : vector<32xf32>
      %31 = vector.multi_reduction <add>, %30, %cst_20 [0] : vector<8x32xf32> to vector<32xf32>
      %32 = vector.shape_cast %31 : vector<32xf32> to vector<1x32xf32>
      %cst_21 = arith.constant 8.000000e+00 : f32
      %33 = vector.broadcast %cst_21 : f32 to vector<1x32xf32>
      %34 = arith.divf %32, %33 : vector<1x32xf32>
      %35 = arith.mulf %30, %30 : vector<8x32xf32>
      %cst_22 = arith.constant dense<0.000000e+00> : vector<32xf32>
      %36 = vector.multi_reduction <add>, %35, %cst_22 [0] : vector<8x32xf32> to vector<32xf32>
      %37 = vector.shape_cast %36 : vector<32xf32> to vector<1x32xf32>
      %cst_23 = arith.constant 8.000000e+00 : f32
      %38 = vector.broadcast %cst_23 : f32 to vector<1x32xf32>
      %39 = arith.divf %37, %38 : vector<1x32xf32>
      %40 = arith.mulf %34, %34 : vector<1x32xf32>
      %41 = arith.subf %39, %40 : vector<1x32xf32>
      %cst_24 = arith.constant 0.000000e+00 : f32
      %42 = vector.broadcast %cst_24 : f32 to vector<1x32xf32>
      %43 = arith.maximumf %41, %42 : vector<1x32xf32>
      %44 = vector.broadcast %34 : vector<1x32xf32> to vector<8x32xf32>
      %45 = arith.subf %30, %44 : vector<8x32xf32>
      %cst_25 = arith.constant 9.99999974E-6 : f32
      %46 = vector.broadcast %cst_25 : f32 to vector<1x32xf32>
      %47 = arith.addf %43, %46 : vector<1x32xf32>
      %48 = math.rsqrt %47 : vector<1x32xf32>
      %49 = vector.broadcast %48 : vector<1x32xf32> to vector<8x32xf32>
      %50 = arith.mulf %45, %49 : vector<8x32xf32>
      %51 = vector.broadcast %21 : vector<1x32xf32> to vector<8x32xf32>
      %52 = arith.mulf %50, %51 : vector<8x32xf32>
      %53 = vector.broadcast %22 : vector<1x32xf32> to vector<8x32xf32>
      %54 = arith.addf %52, %53 : vector<8x32xf32>
      %cst_26 = arith.constant 0.000000e+00 : f32
      %55 = vector.broadcast %cst_26 : f32 to vector<8x32xf32>
      %56 = arith.maximumf %54, %55 : vector<8x32xf32>
      %c0_27 = arith.constant 0 : index
      %c0_28 = arith.constant 0 : index
      %57 = vector.load %arg4[%c0_27, %c0_28] : memref<32x32xbf16, #tpu.memory_space<vmem>>, vector<32x32xbf16>
      %58 = arith.extf %57 : vector<32x32xbf16> to vector<32x32xf32>
      %cst_29 = arith.constant dense<0.000000e+00> : vector<8x32xf32>
      %59 = tpu.matmul %56, %58, %cst_29 {dimension_numbers = #tpu.dot_dimension_numbers<[1], [0], [0], [1], [0, 0, 1, 1], [], []>} : vector<8x32xf32>, vector<32x32xf32>, vector<8x32xf32> -> vector<8x32xf32>
      %60 = vector.broadcast %23 : vector<1x32xf32> to vector<8x32xf32>
      %61 = arith.addf %59, %60 : vector<8x32xf32>
      %cst_30 = arith.constant dense<0.000000e+00> : vector<32xf32>
      %62 = vector.multi_reduction <add>, %61, %cst_30 [0] : vector<8x32xf32> to vector<32xf32>
      %63 = vector.shape_cast %62 : vector<32xf32> to vector<1x32xf32>
      %cst_31 = arith.constant 8.000000e+00 : f32
      %64 = vector.broadcast %cst_31 : f32 to vector<1x32xf32>
      %65 = arith.divf %63, %64 : vector<1x32xf32>
      %66 = arith.mulf %61, %61 : vector<8x32xf32>
      %cst_32 = arith.constant dense<0.000000e+00> : vector<32xf32>
      %67 = vector.multi_reduction <add>, %66, %cst_32 [0] : vector<8x32xf32> to vector<32xf32>
      %68 = vector.shape_cast %67 : vector<32xf32> to vector<1x32xf32>
      %cst_33 = arith.constant 8.000000e+00 : f32
      %69 = vector.broadcast %cst_33 : f32 to vector<1x32xf32>
      %70 = arith.divf %68, %69 : vector<1x32xf32>
      %71 = arith.mulf %65, %65 : vector<1x32xf32>
      %72 = arith.subf %70, %71 : vector<1x32xf32>
      %cst_34 = arith.constant 0.000000e+00 : f32
      %73 = vector.broadcast %cst_34 : f32 to vector<1x32xf32>
      %74 = arith.maximumf %72, %73 : vector<1x32xf32>
      %75 = vector.broadcast %65 : vector<1x32xf32> to vector<8x32xf32>
      %76 = arith.subf %61, %75 : vector<8x32xf32>
      %cst_35 = arith.constant 9.99999974E-6 : f32
      %77 = vector.broadcast %cst_35 : f32 to vector<1x32xf32>
      %78 = arith.addf %74, %77 : vector<1x32xf32>
      %79 = math.rsqrt %78 : vector<1x32xf32>
      %80 = vector.broadcast %79 : vector<1x32xf32> to vector<8x32xf32>
      %81 = arith.mulf %76, %80 : vector<8x32xf32>
      %c0_36 = arith.constant 0 : index
      %82 = memref.load %arg5[%c0_36] : memref<2xf32, #tpu.memory_space<smem>>
      %83 = vector.broadcast %82 : f32 to vector<8x32xf32>
      %84 = arith.mulf %83, %81 : vector<8x32xf32>
      %c1 = arith.constant 1 : index
      %85 = memref.load %arg5[%c1] : memref<2xf32, #tpu.memory_space<smem>>
      %86 = vector.broadcast %85 : f32 to vector<8x32xf32>
      %87 = arith.addf %84, %86 : vector<8x32xf32>
      %cst_37 = arith.constant -13.8155107 : f32
      %88 = vector.broadcast %cst_37 : f32 to vector<8x32xf32>
      %89 = arith.maximumf %87, %88 : vector<8x32xf32>
      %cst_38 = arith.constant -13.8155107 : f32
      %90 = vector.broadcast %cst_38 : f32 to vector<8x32xf32>
      %91 = arith.subf %90, %89 : vector<8x32xf32>
      %92 = math.exp %91 : vector<8x32xf32>
      %93 = arith.subf %87, %89 : vector<8x32xf32>
      %94 = math.exp %93 : vector<8x32xf32>
      %95 = arith.addf %92, %94 : vector<8x32xf32>
      %96 = math.log %95 : vector<8x32xf32>
      %97 = arith.addf %89, %96 : vector<8x32xf32>
      %c0_39 = arith.constant 0 : index
      %c0_40 = arith.constant 0 : index
      %98 = vector.load %arg6[%c0_39, %c0_40] : memref<8x32xf32, #tpu.memory_space<vmem>>, vector<8x32xf32>
      tpu.vector_store %arg6[%c0_39, %c0_40], %97 {strides = array<i32>} : memref<8x32xf32, #tpu.memory_space<vmem>>, vector<8x32xf32>,
    } else {
    }
    return
  }
  func.func @transform_0(%arg0: i32) -> (i32, i32) {
    %c0_i32 = arith.constant 0 : i32
    %c0_i32_0 = arith.constant 0 : i32
    return %c0_i32, %arg0 : i32, i32
  }
  func.func @transform_1(%arg0: i32) -> (i32, i32) {
    %c0_i32 = arith.constant 0 : i32
    %c0_i32_0 = arith.constant 0 : i32
    return %arg0, %c0_i32 : i32, i32
  }
  func.func @transform_2(%arg0: i32) -> (i32, i32) {
    %c0_i32 = arith.constant 0 : i32
    %c0_i32_0 = arith.constant 0 : i32
    %c0_i32_1 = arith.constant 0 : i32
    return %c0_i32, %c0_i32_0 : i32, i32
  }
  func.func @transform_3(%arg0: i32) -> (i32, i32) {
    %c0_i32 = arith.constant 0 : i32
    %c0_i32_0 = arith.constant 0 : i32
    %c0_i32_1 = arith.constant 0 : i32
    return %c0_i32, %c0_i32_0 : i32, i32
  }
  func.func @transform_4(%arg0: i32) -> i32 {
    %c0_i32 = arith.constant 0 : i32
    %c0_i32_0 = arith.constant 0 : i32
    return %c0_i32 : i32
  }
  func.func @transform_5(%arg0: i32) -> (i32, i32) {
    %c0_i32 = arith.constant 0 : i32
    %c0_i32_0 = arith.constant 0 : i32
    %c0_i32_1 = arith.constant 0 : i32
    return %c0_i32, %c0_i32_0 : i32, i32
  }
}

</mosaic_0001>

<bundles_post_ra>
// kernel: pfe_head_forward.1
= control target key start
LH: loop header
LB: loop body
LE: loop exit
PB: predicated region body
PF: predicated region fallthrough
CT: control target
= control target key end

     0   :  { %10 = vsyncpa [#allocation6], 0  ;;  %s929_s0 = inlined_call_operand.vmem [shape: f32[8,1408], index: 0, kind: input, shape index: {}]   ;;  %s930_s1 = inlined_call_operand.vmem [shape: bf16[1408,32], index: 1, kind: input, shape index: {}]   ;;  %s931_s2 = inlined_call_operand.vmem [shape: f32[4,32], index: 2, kind: input, shape index: {}]   ;;  %s932_s3 = inlined_call_operand.vmem [shape: bf16[32,32], index: 3, kind: input, shape index: {}]   ;;  %s933_s4 = inlined_call_operand.vmem [shape: f32[2], index: 4, kind: input, shape index: {}]   ;;  %s934_s5 = inlined_call_operand.hbm [shape: f32[8,32], index: 5, kind: output, shape index: {}]  }
   0x1   :  { %11 = vsyncpa [#allocation5], 0  ;;  %s847_s18 = smov 0  }
   0x2 LB: > { %s853_s19 = sadd.s32 4294967295, %s807_s18   ;;  %p623_p0 = scmp.ge.s32.totalorder %s807_s18, 1  ;;  %s807_s18 = sphi %s847_s18, %s17_s18  }
   0x3   : > { %p158_p1 = scmp.lt.s32.totalorder %s807_s18, 12  ;;  %s177_s22 = sshll.u32 %s933_s4, 4  ;;  %s178_s22 = int_to_ptr.vmem [resolvable:$true] %s177_s22 }
   0x4   : > { %p713_p4 = scmp.eq.s32.totalorder %s853_s19, 0  ;;  %s754_s24 = scalar_lea.vmem %s178_s22, 16 }
   0x5   : > { %p861_p3 = pnand %p623_p0, %p158_p1  ;;  %p755_p7 = scmp.ne.s32.totalorder %s178_s22, %s754_s24 }
   0x6   : > { %p762_p11 = scmp.lt.s32.totalorder %s178_s22, %s178_s22  ;;  %p763_p12 = scmp.lt.s32.totalorder %s754_s24, %s754_s24 }
   0x7   : > { %p709_p5 = pneg %p861_p3 }
   0x8   : > { %p764_p13 = por %p763_p12, %p762_p11 }
   0x9   : > { %p710_p6 = pnand %p713_p4, %p709_p5 }
   0xb   : > { %p756_p8 = pneg %p710_p6 }
   0xd   : > { %p757_p9 = pnand %p756_p8, %p755_p7 }
   0xf   : > { %p758_p10 = pneg %p757_p9 }
  0x11   : > { %p765_p2 = pnand %p764_p13, %p758_p10 }
  0x13   : > { %768 = shalt.err (!%p765_p2)
}
  0x14   : > { %s809_s25 = smov [#allocation4]   ;;  %206 = sbr.rel (%p861_p3) target bundleno = 754 (0x2f2), region = 40 }
  0x15   : > { %712 = dma.vmem_to_smem (!%p710_p6), %s178_s22, 16, %s809_s25, [#allocation6]  }
  0x19   : > { %798 = dma.done.wait (%p713_p4), [#allocation6], 16  }
  0x1a   : > { %800 = vsyncadd (%p713_p4), [#allocation6], 4294967280 }
  0x1b   : > { %212 = sfence }
  0x1c   : > { %p234_p0 = scmp.lt.s32.totalorder %s853_s19, 10  ;;  %s629_s26 = sshll.u32 %s853_s19, 4 }
  0x1d   : > { %p239_p1 = scmp.lt.s32.totalorder %s629_s26, 175  ;;  %p936_p2 = scmp.ne.s32.totalorder %s853_s19, 0 }
  0x1e   : > { %s235_s27 = scalar_select %p234_p0, %s853_s19, 10 }
  0x1f   : > { %s938_s26 = smov (!%p239_p1, %s629_s26), 175  ;;  %248 = sbr.rel (%p936_p2) target bundleno = 39 (0x27), region = 48 }
  0x20   : > { %s628_s28 = sshll.u32 %s235_s27, 3  ;;  %s630_s7 = sshll.u32 %s938_s26, 2 }
  0x21   : > { %s237_s6 = scalar_lea.vmem %s929_s0, %s628_s28  ;;  %s885_s10 = scalar_lea.vmem %s930_s1, %s630_s7 }
  0x24   : > { %vm249_vm0 = vcmask 261120   ;;  %vm251_vm1 = vcmask 7168   ;;  %v810_v0 = vmov 0.0  }
  0x25   : > { %250 = vst.msk [vmem:[#allocation2] sm:$0xff] %vm249_vm0, %v810_v0 }
  0x26   : > { %252 = vst.msk [vmem:[#allocation3] sm:$0xff] %vm251_vm1, %v810_v0 }
  0x27 PF: > { %v733_v1 = vld [vmem:[%s885_s10 + $0x38] sm:$0xff]   ;;  %v811_v2 = vmov 0.0   ;;  %v734_v3 = vld [vmem:[%s885_s10 + $0x30] sm:$0xff]   ;;  %vm812_vm2 = vmmov 0   ;;  %v735_v4 = vld [vmem:[%s885_s10 + $0x28] sm:$0xff]   ;;  %vm259_vm3 = vcmask 7168  }
  0x28   : > { %670 = vmatprep.subr.bf16.mxu0 %v811_v2  ;;  %686 = vmatprep.mubr.msk.bf16.mxu0 %vm812_vm2, %v811_v2  ;;  %v253_v5 = vld [vmem:[%s237_s6] sm:$0xff]  ;;  %v737_v8 = vld [vmem:[%s885_s10 + $0x18] sm:$0xff]   ;;  %v738_v9 = vld [vmem:[%s885_s10 + $0x10] sm:$0xff]   ;;  %vm368_vm4 = vcmask 261120   ;;  %p640_p3 = scmp.ne.s32.totalorder %s853_s19, 10 }
  0x29   : > { %671 = vmatpush3.bf16.msra.mxu0 %v733_v1  ;;  %v255_v6 = vmul.f32 %v253_v5, %v253_v5  ;;  %v736_v7 = vld [vmem:[%s885_s10 + $0x20] sm:$0xff]   ;;  %v739_v10 = vld [vmem:[%s885_s10 + $0x8] sm:$0xff]   ;;  %v262_v12 = vpack.c.bf16 %v253_v5, %v253_v5  ;;  %s534_s17 = sld [smem:[#allocation4]] (!%p640_p3) }
  0x2a   : > { %672 = vmatprep.subr.bf16.mxu0 %v811_v2  ;;  %v740_v11 = vld [vmem:[%s885_s10] sm:$0xff]   ;;  %s642_s20 = sld [smem:[#allocation4 + $0x1]] (!%p640_p3) }
  0x2b   : > { %256 = vadd.xlane.f32.xlu0 %v255_v6 }
  0x2c   : > { %v261_v16 = vld [vmem:[#allocation2] sm:$0xff] }
  0x2d   : > { %673 = vmatpush3.bf16.msra.mxu0 %v734_v3  ;;  %v254_v13 = vld [vmem:[#allocation3] sm:$0xff] }
  0x2e   : > { %674 = vmatprep.subr.bf16.mxu0 %v811_v2 }
  0x31   : > { %675 = vmatpush3.bf16.msra.mxu0 %v735_v4 }
  0x32   : > { %676 = vmatprep.subr.bf16.mxu0 %v811_v2 }
  0x35   : > { %677 = vmatpush3.bf16.msra.mxu0 %v736_v7 }
  0x36   : > { %678 = vmatprep.subr.bf16.mxu0 %v811_v2 }
  0x39   : > { %679 = vmatpush3.bf16.msra.mxu0 %v737_v8 }
  0x3a   : > { %680 = vmatprep.subr.bf16.mxu0 %v811_v2 }
  0x3d   : > { %681 = vmatpush3.bf16.msra.mxu0 %v738_v9 }
  0x3e   : > { %682 = vmatprep.subr.bf16.mxu0 %v811_v2 }
  0x41   : > { %683 = vmatpush3.bf16.msra.mxu0 %v739_v10 }
  0x42   : > { %684 = vmatprep.subr.bf16.mxu0 %v811_v2 }
  0x45   : > { %685 = vmatpush3.bf16.msra.mxu0 %v740_v11 }
  0x48   : > { %687 = vmatmul.mubr.bf16.vlgmr.msra.gmra.mxu0 %v262_v12 }
  0xb4   : > { %v257_v14 = vpop.xlane.xlu0 %256 }
  0xb5   : > { %v258_v15 = vadd.f32 %v257_v14, %v254_v13 }
  0xb7   : > { %260 = vst.msk [vmem:[#allocation3] sm:$0xff] %vm259_vm3, %v258_v15 }
 0x108   : > { %v361_v17 = vpop.f32.mrf.mxu0 }
 0x109   : > { %v367_v18 = vadd.f32 %v361_v17, %v261_v16 }
 0x10a   : > { %v688_v19 = vpop.f32.mrf.mxu0  ;;  %373 = sbr.rel (%p640_p3) target bundleno = 739 (0x2e3), region = 52 }
 0x10b   : > { %369 = vst.msk [vmem:[#allocation2] sm:$0xff] %vm368_vm4, %v367_v18 }
 0x10c   : > { %v364_v20 = vpop.f32.mrf.mxu0 }
 0x10e   : > { %v689_v21 = vpop.f32.mrf.mxu0 }
 0x10f   : > { %v376_v22 = vld [vmem:[#allocation3] sm:$0xff]  ;;  %v813_v23 = vmov 0   ;;  %v648_v26 = vld [vmem:[%s932_s3] sm:$0xff]   ;;  %v814_v27 = vmov 0.0   ;;  %vm815_vm5 = vmmov 0   ;;  %v384_v32 = vlaneseq }
 0x110   : > { %741 = vset.pattern.permute.xlu0 %v813_v23  ;;  %742 = vrsqrt.f32 %v376_v22  ;;  %v655_v25 = vld [vmem:[%s932_s3 + $0x8] sm:$0xff]   ;;  %690 = vmatprep.subr.mxu0 %v814_v27  ;;  %v650_v30 = vunpack.c.h.bf16 %v648_v26  ;;  %v649_v31 = vunpack.c.l.bf16 %v648_v26  ;;  %v374_v35 = vld [vmem:[%s931_s2] sm:$0xf] }
 0x111   : > { %v653_v28 = vunpack.c.l.bf16 %v655_v25  ;;  %v654_v29 = vunpack.c.h.bf16 %v655_v25  ;;  %698 = vmatprep.mubr.msk.f32.mxu0 %vm815_vm5, %v814_v27  ;;  %v385_v33 = vshrl.u32 %v384_v32, 7 }
 0x112   : > { %v375_v38 = vld [vmem:[#allocation2] sm:$0xff] }
 0x113   : > { %691 = vmatpush3.msra.mxu0 %v654_v29  ;;  %v435_v34 = vsub.s32 3, %v385_v33  ;;  %v386_v37 = vsub.s32 0, %v385_v33  ;;  %v416_v0 = vsub.s32 1, %v385_v33  ;;  %v421_v1 = vsub.s32 2, %v385_v33 }
 0x114   : > { %692 = vmatprep.subr.mxu0 %v814_v27 }
 0x115   : > { %693 = vmatpush3.msra.mxu0 %v653_v28  ;;  %v436_v36 = vrot.slane %v374_v35, %v435_v34  ;;  %v387_v39 = vrot.slane %v374_v35, %v386_v37  ;;  %v417_v3 = vrot.slane %v374_v35, %v416_v0  ;;  %v422_v6 = vrot.slane %v374_v35, %v421_v1 }
 0x116   : > { %694 = vmatprep.subr.mxu0 %v814_v27 }
 0x117   : > { %695 = vmatpush3.msra.mxu0 %v650_v30 }
 0x118   : > { %696 = vmatprep.subr.mxu0 %v814_v27 }
 0x119   : > { %697 = vmatpush3.msra.mxu0 %v649_v31 }
 0x11d   : > { %v743_v24 = vpop.eup %742 }
 0x11e   : > { %380 = vperm.xlu0 %741, %v743_v24  }
 0x199   : > { %v381_v40 = vpop.permute.xlu0 %380 }
 0x19a   : > { %v383_v41 = vmul.f32 %v381_v40, %v375_v38  ;;  %v538_v38 = vstv %s642_s20 }
 0x19c   : > { %v388_v42 = vadd.f32 %v387_v39, %v383_v41 }
 0x19e   : > { %v389_v43 = vsel %vm368_vm4, %v388_v42, 0.0  ;;  %v398_v44 = vmul.f32 %v388_v42, %v388_v42 }
 0x19f   : > { %v390_v45 = vrot.slane %v389_v43, 4 }
 0x1a0   : > { %v399_v46 = vsel %vm368_vm4, %v398_v44, 0.0 }
 0x1a1   : > { %v391_v47 = vadd.f32 %v390_v45, %v389_v43  ;;  %v400_v48 = vrot.slane %v399_v46, 4 }
 0x1a3   : > { %v392_v49 = vrot.slane %v391_v47, 2  ;;  %v401_v50 = vadd.f32 %v400_v48, %v399_v46 }
 0x1a5   : > { %v393_v51 = vadd.f32 %v392_v49, %v391_v47  ;;  %v402_v52 = vrot.slane %v401_v50, 2 }
 0x1a7   : > { %v394_v53 = vrot.slane %v393_v51, 1  ;;  %v403_v54 = vadd.f32 %v402_v52, %v401_v50 }
 0x1a9   : > { %v395_v55 = vadd.f32 %v394_v53, %v393_v51  ;;  %v404_v56 = vrot.slane %v403_v54, 1 }
 0x1ab   : > { %v397_v57 = vmul.f32 0.125, %v395_v55  ;;  %v405_v58 = vadd.f32 %v404_v56, %v403_v54 }
 0x1ad   : > { %v406_v59 = vmul.f32 0.125, %v405_v58  ;;  %v407_v60 = vmul.f32 %v397_v57, %v397_v57  ;;  %v410_v2 = vsub.f32 %v388_v42, %v397_v57 }
 0x1af   : > { %v408_v61 = vsub.f32 %v406_v59, %v407_v60 }
 0x1b1   : > { %v409_v62 = vmax.f32 %v408_v61, 0.0 }
 0x1b3   : > { %v411_v63 = vadd.f32 1e-05, %v409_v62 }
 0x1b5   : > { %744 = vrsqrt.f32 %v411_v63 }
 0x1c2   : > { %v745_v4 = vpop.eup %744 }
 0x1c3   : > { %v413_v5 = vmul.f32 %v745_v4, %v410_v2 }
 0x1c5   : > { %v418_v7 = vmul.f32 %v417_v3, %v413_v5 }
 0x1c7   : > { %v423_v8 = vadd.f32 %v422_v6, %v418_v7 }
 0x1c9   : > { %v424_v9 = vmax.f32 %v423_v8, 0.0 }
 0x1cb   : > { %699 = vmatmul.mubr.msk.f32.vlgmr.msra.gmra.mxu0 %vm368_vm4, %v424_v9 }
 0x28b   : > { %v506_v10 = vpop.f32.mrf.mxu0 }
 0x28c   : > { %v507_v11 = vadd.f32 %v506_v10, %v436_v36  ;;  %v535_v36 = vstv %s534_s17 }
 0x28d   : > { %v700_v12 = vpop.f32.mrf.mxu0 }
 0x28e   : > { %v510_v13 = vsel %vm368_vm4, %v507_v11, 0.0  ;;  %v518_v14 = vmul.f32 %v507_v11, %v507_v11 }
 0x28f   : > { %v511_v15 = vrot.slane %v510_v13, 4 }
 0x290   : > { %v519_v16 = vsel %vm368_vm4, %v518_v14, 0.0 }
 0x291   : > { %v512_v17 = vadd.f32 %v511_v15, %v510_v13  ;;  %v520_v18 = vrot.slane %v519_v16, 4 }
 0x293   : > { %v513_v19 = vrot.slane %v512_v17, 2  ;;  %v521_v20 = vadd.f32 %v520_v18, %v519_v16 }
 0x295   : > { %v514_v21 = vadd.f32 %v513_v19, %v512_v17  ;;  %v522_v22 = vrot.slane %v521_v20, 2 }
 0x297   : > { %v515_v23 = vrot.slane %v514_v21, 1  ;;  %v523_v24 = vadd.f32 %v522_v22, %v521_v20 }
 0x299   : > { %v516_v25 = vadd.f32 %v515_v23, %v514_v21  ;;  %v524_v26 = vrot.slane %v523_v24, 1 }
 0x29b   : > { %v517_v27 = vmul.f32 0.125, %v516_v25  ;;  %v525_v28 = vadd.f32 %v524_v26, %v523_v24 }
 0x29d   : > { %v526_v29 = vmul.f32 0.125, %v525_v28  ;;  %v527_v30 = vmul.f32 %v517_v27, %v517_v27  ;;  %v530_v34 = vsub.f32 %v507_v11, %v517_v27 }
 0x29f   : > { %v528_v31 = vsub.f32 %v526_v29, %v527_v30 }
 0x2a1   : > { %v529_v32 = vmax.f32 %v528_v31, 0.0 }
 0x2a3   : > { %v531_v33 = vadd.f32 1e-05, %v529_v32 }
 0x2a5   : > { %746 = vrsqrt.f32 %v531_v33 }
 0x2b2   : > { %v747_v35 = vpop.eup %746 }
 0x2b3   : > { %v533_v37 = vmul.f32 %v747_v35, %v530_v34 }
 0x2b5   : > { %v536_v39 = vmul.f32 %v535_v36, %v533_v37 }
 0x2b7   : > { %v539_v40 = vadd.f32 %v538_v38, %v536_v39 }
 0x2b9   : > { %v540_v41 = vmax.f32 %v539_v40, -13.815511 }
 0x2bb   : > { %v541_v42 = vsub.f32 -13.815511, %v540_v41  ;;  %v544_v43 = vsub.f32 %v539_v40, %v540_v41 }
 0x2bd   : > { %v542_v44 = vmul.f32 1.442695, %v541_v42  ;;  %v545_v45 = vmul.f32 1.442695, %v544_v43 }
 0x2bf   : > { %748 = vpow2.f32 %v542_v44 }
 0x2c0   : > { %750 = vpow2.f32 %v545_v45 }
 0x2cc   : > { %v749_v46 = vpop.eup %748 }
 0x2cd   : > { %v751_v47 = vpop.eup %750 }
 0x2ce   : > { %v547_v48 = vadd.f32 %v751_v47, %v749_v46 }
 0x2d0   : > { %752 = vlog2.f32 %v547_v48 }
 0x2dd   : > { %v753_v49 = vpop.eup %752 }
 0x2de   : > { %v549_v50 = vmul.f32 0.6931472, %v753_v49 }
 0x2e0   : > { %v550_v51 = vadd.f32 %v549_v50, %v540_v41 }
 0x2e2   : > { %551 = vst.msk [vmem:[#allocation7] sm:$0xff] %vm368_vm4, %v550_v51 }
 0x2e3 PF: > { %p715_p4 = scmp.eq.s32.totalorder %s853_s19, 10  ;;  %s816_s21 = smov [#allocation7]  }
 0x2e4   : > { %s559_s22 = sshll.u32 %s816_s21, 4  ;;  %s560_s22 = int_to_ptr.vmem [resolvable:$true] %s559_s22 }
 0x2e5   : > { %s769_s23 = scalar_lea.vmem %s560_s22, 128  ;;  %p776_p8 = scmp.lt.s32.totalorder %s560_s22, %s560_s22 }
 0x2e6   : > { %p770_p5 = scmp.ne.s32.totalorder %s560_s22, %s769_s23  ;;  %p777_p9 = scmp.lt.s32.totalorder %s769_s23, %s769_s23 }
 0x2e8   : > { %p771_p6 = pnand %p770_p5, %p715_p4  ;;  %p778_p10 = por %p777_p9, %p776_p8 }
 0x2ea   : > { %p772_p7 = pneg %p771_p6 }
 0x2ec   : > { %p779_p11 = pnand %p778_p10, %p772_p7 }
 0x2ee   : > { %782 = shalt.err (!%p779_p11)
}
 0x2ef   : > { %706 = dma.vmem_to_hbm [thread:$0]  (%p715_p4), %s560_s22, 128, %s934_s5, [#allocation5]  }
 0x2f0   : > { %802 = dma.done.wait (%p715_p4), [#allocation5], 128  }
 0x2f1   : > { %804 = vsyncadd (%p715_p4), [#allocation5], 4294967168 }
 0x2f2 PF: > { %s17_s18 = sadd.s32 1, %s807_s18  }
 0x2f3   : > { %p14_p12 = scmp.ge.s32.totalorder %s17_s18, 13  }
 0x2f5   :  { %16 = sbr.rel (!%p14_p12) target bundleno = 2 (0x2), region = 83 }
 0x2fa   :  { %572 = vsyncpa [#allocation5], 1 }
 0x2fb   :  { %574 = vsyncpa [#allocation5 + $0x1], 1 }
 0x2fc   :  { %575 = vsyncpa [#allocation6], 1 }
 0x2fd   :  { %577 = vsyncpa [#allocation6 + $0x1], 1 }

</bundles_post_ra>
